<compile_context>
chip_gen: v7x
topology: tpu7x:2x2x1
jax: 0.10.0
libtpu: 0.0.40
codegen_flags: <defaults>
</compile_context>

<pallas_src>
import jax
import jax.numpy as jnp
from jax import lax
from jax.experimental import pallas as pl
from jax.experimental.pallas import tpu as pltpu

INPUT_SIZE = 14 * 14   # 196
HIDDEN = 64
HIDDEN_PAD = 128       # lane-aligned hidden size (zero-padded)
NUM_CLASSES = 10


def _round_up(x, m):
    return (x + m - 1) // m * m


# -----------------------------------------------------------------------------
# Kernel 1: batched input projection   (M, I) @ (I, Hp) + b  ->  (M, Hp)
# -----------------------------------------------------------------------------
def _proj_kernel(x_ref, w_ref, b_ref, o_ref):
    o_ref[...] = (
        jnp.dot(x_ref[...], w_ref[...], preferred_element_type=jnp.float32)
        + b_ref[...]
    ).astype(o_ref.dtype)


def _input_projection(x_mi, wih_t_pad, bias_pad):
    M, I = x_mi.shape
    Hp = wih_t_pad.shape[1]
    tm = min(256, M)                 # M is already a multiple of 8
    M_pad = _round_up(M, tm)
    if M_pad != M:
        x_mi = jnp.pad(x_mi, ((0, M_pad - M), (0, 0)))

    out = pl.pallas_call(
        _proj_kernel,
        out_shape=jax.ShapeDtypeStruct((M_pad, Hp), jnp.float32),
        grid_spec=pltpu.PrefetchScalarGridSpec(
            num_scalar_prefetch=0,
            grid=(M_pad // tm,),
            in_specs=[
                pl.BlockSpec((tm, I), lambda m: (m, 0)),     # x rows tile
                pl.BlockSpec((I, Hp), lambda m: (0, 0)),     # W_ih^T (padded)
                pl.BlockSpec((1, Hp), lambda m: (0, 0)),     # b_ih + b_hh (padded)
            ],
            out_specs=pl.BlockSpec((tm, Hp), lambda m: (m, 0)),
        ),
        compiler_params=pltpu.CompilerParams(
            dimension_semantics=("parallel",),
        ),
    )(x_mi, wih_t_pad, bias_pad)
    return out[:M]


# -----------------------------------------------------------------------------
# Kernel 2: recurrence   h_t = tanh(x_proj_t + h_{t-1} @ W_hh^T)
# -----------------------------------------------------------------------------
def _recurrence_kernel(xp_ref, whh_ref, h_out_ref, h_scratch):
    ti = pl.program_id(1)

    @pl.when(ti == 0)
    def _():
        h_scratch[...] = jnp.zeros_like(h_scratch)

    whh = whh_ref[...]            # hoisted out of the unrolled loop
    t_blk = xp_ref.shape[0]       # static

    def step(i, h):
        pre = xp_ref[i] + jnp.dot(h, whh, preferred_element_type=jnp.float32)
        return jnp.tanh(pre)

    h = lax.fori_loop(0, t_blk, step, h_scratch[...], unroll=True)
    h_scratch[...] = h

    @pl.when(ti == pl.num_programs(1) - 1)
    def _():
        h_out_ref[...] = h.astype(h_out_ref.dtype)


def _recurrence(x_proj_tbh, whh_t_pad, t_blk, b_blk):
    T, B_pad, Hp = x_proj_tbh.shape
    nb = B_pad // b_blk
    nt = T // t_blk

    return pl.pallas_call(
        _recurrence_kernel,
        out_shape=jax.ShapeDtypeStruct((B_pad, Hp), jnp.float32),
        grid_spec=pltpu.PrefetchScalarGridSpec(
            num_scalar_prefetch=0,
            grid=(nb, nt),                                   # time (serial) axis last
            in_specs=[
                pl.BlockSpec((t_blk, b_blk, Hp), lambda bi, ti: (ti, bi, 0)),
                pl.BlockSpec((Hp, Hp), lambda bi, ti: (0, 0)),
            ],
            out_specs=pl.BlockSpec((b_blk, Hp), lambda bi, ti: (bi, 0)),
            scratch_shapes=[pltpu.VMEM((b_blk, Hp), jnp.float32)],
        ),
        compiler_params=pltpu.CompilerParams(
            dimension_semantics=("parallel", "arbitrary"),   # batch parallel (v7x 2-TC)
        ),
    )(x_proj_tbh, whh_t_pad)


# -----------------------------------------------------------------------------
# Full forward
# -----------------------------------------------------------------------------
def rnn_model_forward(x_btI, params):
    """x_btI: (B, T, I) float32. Returns (B, 10) float32."""
    w_ih, w_hh, b_ih, b_hh, w_fc, b_fc = params
    B, T, I = x_btI.shape
    H = w_hh.shape[0]
    Hp = HIDDEN_PAD

    # Batch padding: multiple of 8 sublanes (or of 128 when large).
    B_pad = _round_up(B, 8)
    if B_pad > 128:
        B_pad = _round_up(B, 128)
    b_blk = min(B_pad, 128)

    # Time block: largest divisor of T that is <= 16 (amortizes grid overhead,
    # keeps the resident x_proj block tiny -> safe on v7x's 64 MiB VMEM).
    t_blk = max(d for d in range(1, min(T, 16) + 1) if T % d == 0)

    # Weights padded so the hidden dim is lane-aligned; extra lanes stay zero.
    wih_t = jnp.pad(w_ih.T, ((0, 0), (0, Hp - H)))             # (I, Hp)
    whh_t = jnp.pad(w_hh.T, ((0, Hp - H), (0, Hp - H)))        # (Hp, Hp)
    bias = jnp.pad(b_ih + b_hh, (0, Hp - H))[None, :]          # (1, Hp)

    # Time-major, batch-padded input, flattened for the one big projection matmul.
    x_p = jnp.pad(x_btI, ((0, B_pad - B), (0, 0), (0, 0)))     # (B_pad, T, I)
    x_tb = jnp.transpose(x_p, (1, 0, 2)).reshape(T * B_pad, I)  # (T*B_pad, I)

    x_proj = _input_projection(x_tb, wih_t, bias)               # (T*B_pad, Hp)
    x_proj = x_proj.reshape(T, B_pad, Hp)

    h_last = _recurrence(x_proj, whh_t, t_blk, b_blk)           # (B_pad, Hp)

    # Final Linear(64, 10): tiny GEMM on the last hidden state, left to XLA
    # (keeps the Pallas output lane-dense; removes two weight DMAs from the kernel).
    h_T = h_last[:B, :H]
    return h_T @ w_fc.T + b_fc[None, :]


# -----------------------------------------------------------------------------
# Params / reference / main
# -----------------------------------------------------------------------------
def init_params(key):
    """Deterministic parameter init mirroring the PyTorch module's shapes."""
    k1, k2, k3, k4, k5, k6 = jax.random.split(key, 6)
    bound = 1.0 / jnp.sqrt(HIDDEN)
    w_ih = jax.random.uniform(k1, (HIDDEN, INPUT_SIZE), jnp.float32, -bound, bound)
    w_hh = jax.random.uniform(k2, (HIDDEN, HIDDEN), jnp.float32, -bound, bound)
    b_ih = jax.random.uniform(k3, (HIDDEN,), jnp.float32, -bound, bound)
    b_hh = jax.random.uniform(k4, (HIDDEN,), jnp.float32, -bound, bound)
    w_fc = jax.random.uniform(k5, (NUM_CLASSES, HIDDEN), jnp.float32, -bound, bound)
    b_fc = jax.random.uniform(k6, (NUM_CLASSES,), jnp.float32, -bound, bound)
    return (w_ih, w_hh, b_ih, b_hh, w_fc, b_fc)


def reference_forward(x_btI, params):
    """Pure-JAX reference (same math) for a sanity check."""
    w_ih, w_hh, b_ih, b_hh, w_fc, b_fc = params
    B, T, I = x_btI.shape
    h = jnp.zeros((B, HIDDEN), jnp.float32)
    for t in range(T):
        h = jnp.tanh(x_btI[:, t, :] @ w_ih.T + b_ih + h @ w_hh.T + b_hh)
    return h @ w_fc.T + b_fc


if __name__ == "__main__":
    key = jax.random.PRNGKey(0)
    kx, kp = jax.random.split(key)

    B, T = 2, 8
    x = jax.random.normal(kx, (B, T, INPUT_SIZE), jnp.float32)
    params = init_params(kp)

    out = rnn_model_forward(x, params)
    out = jax.block_until_ready(out)

    ref = reference_forward(x, params)
    assert out.shape == (B, NUM_CLASSES)
    assert jnp.allclose(out, ref, atol=1e-4, rtol=1e-4), "Pallas kernel mismatch vs reference"

    print("KERNEL_OK")
</pallas_src>

<mosaic_0001>
module attributes {stable_mosaic.version = 11 : i64} {
  func.func @_proj_kernel(%arg0: i32, %arg1: memref<64x196xf32, #tpu.memory_space<vmem>>, %arg2: memref<196x128xf32, #tpu.memory_space<vmem>>, %arg3: memref<1x128xf32, #tpu.memory_space<vmem>>, %arg4: memref<64x128xf32, #tpu.memory_space<vmem>>) attributes {dimension_semantics = [#tpu.dimension_semantics<parallel>], iteration_bounds = array<i64: 1>, scalar_prefetch = 0 : i64, scratch_operands = 0 : i64, tpu.core_type = #tpu.core_type<tc>, window_params = [{transform_indices = @transform_0, window_bounds = array<i64: 64, 196>}, {pipeline_mode = #tpu.pipeline_mode<synchronous>, transform_indices = @transform_1, window_bounds = array<i64: 196, 128>}, {pipeline_mode = #tpu.pipeline_mode<synchronous>, transform_indices = @transform_2, window_bounds = array<i64: 1, 128>}, {transform_indices = @transform_3, window_bounds = array<i64: 64, 128>}]} {
    %c0 = arith.constant 0 : index
    %c0_0 = arith.constant 0 : index
    %0 = vector.load %arg1[%c0, %c0_0] : memref<64x196xf32, #tpu.memory_space<vmem>>, vector<64x196xf32>
    %c0_1 = arith.constant 0 : index
    %c0_2 = arith.constant 0 : index
    %1 = vector.load %arg2[%c0_1, %c0_2] : memref<196x128xf32, #tpu.memory_space<vmem>>, vector<196x128xf32>
    %cst = arith.constant dense<0.000000e+00> : vector<64x128xf32>
    %2 = tpu.matmul %0, %1, %cst {dimension_numbers = #tpu.dot_dimension_numbers<[1], [0], [0], [1], [0, 0, 1, 1], [], []>} : vector<64x196xf32>, vector<196x128xf32>, vector<64x128xf32> -> vector<64x128xf32>
    %c0_3 = arith.constant 0 : index
    %c0_4 = arith.constant 0 : index
    %3 = vector.load %arg3[%c0_3, %c0_4] : memref<1x128xf32, #tpu.memory_space<vmem>>, vector<1x128xf32>
    %4 = vector.broadcast %3 : vector<1x128xf32> to vector<64x128xf32>
    %5 = arith.addf %2, %4 : vector<64x128xf32>
    %c0_5 = arith.constant 0 : index
    %c0_6 = arith.constant 0 : index
    %6 = vector.load %arg4[%c0_5, %c0_6] : memref<64x128xf32, #tpu.memory_space<vmem>>, vector<64x128xf32>
    tpu.vector_store %arg4[%c0_5, %c0_6], %5 {strides = array<i32>} : memref<64x128xf32, #tpu.memory_space<vmem>>, vector<64x128xf32>,
    return
  }
  func.func @transform_0(%arg0: i32) -> (i32, i32) {
    %c0_i32 = arith.constant 0 : i32
    %c0_i32_0 = arith.constant 0 : i32
    return %arg0, %c0_i32 : i32, i32
  }
  func.func @transform_1(%arg0: i32) -> (i32, i32) {
    %c0_i32 = arith.constant 0 : i32
    %c0_i32_0 = arith.constant 0 : i32
    %c0_i32_1 = arith.constant 0 : i32
    return %c0_i32, %c0_i32_0 : i32, i32
  }
  func.func @transform_2(%arg0: i32) -> (i32, i32) {
    %c0_i32 = arith.constant 0 : i32
    %c0_i32_0 = arith.constant 0 : i32
    %c0_i32_1 = arith.constant 0 : i32
    return %c0_i32, %c0_i32_0 : i32, i32
  }
  func.func @transform_3(%arg0: i32) -> (i32, i32) {
    %c0_i32 = arith.constant 0 : i32
    %c0_i32_0 = arith.constant 0 : i32
    return %arg0, %c0_i32 : i32, i32
  }
}

</mosaic_0001>

<bundles_post_ra>
// kernel: tpu_custom_call.1
= control target key start
LH: loop header
LB: loop body
LE: loop exit
PB: predicated region body
PF: predicated region fallthrough
CT: control target
= control target key end

     0   :  { %8 = vsyncpa [#allocation3], 0  ;;  %s510_s0 = inlined_call_operand.hbm [shape: f32[64,196], index: 0, kind: input, shape index: {}]   ;;  %s511_s1 = inlined_call_operand.hbm [shape: f32[196,128], index: 1, kind: input, shape index: {}]   ;;  %s512_s2 = inlined_call_operand.vmem [shape: f32[1,128], index: 2, kind: input, shape index: {}]   ;;  %s513_s3 = inlined_call_operand.hbm [shape: f32[64,128], index: 3, kind: output, shape index: {}]  }
   0x1   :  { %9 = vsyncpa [#allocation6], 0 }
   0x2   :  { %10 = vsyncpa [#allocation4], 0  ;;  %s404_s12 = smov [#allocation2]   ;;  %s332_s16 = scalar_lea.hbm %s510_s0, 2048 }
   0x3   :  { %s16_s13 = sshll.u32 %s404_s12, 4  ;;  %p333_p0 = scmp.ne.s32.totalorder %s510_s0, %s332_s16  ;;  %s17_s13 = int_to_ptr.vmem [resolvable:$true] %s16_s13 }
   0x4   :  { %p336_p1 = scmp.lt.u32.totalorder %s332_s16, %s510_s0 }
   0x6   :  { %p338_p2 = pnand %p336_p1, %p333_p0 }
   0x8   :  { %341 = shalt.err (!%p338_p2)
}
   0x9   :  { %s342_s21 = scalar_lea.vmem %s17_s13, 2048  ;;  %p347_p4 = scmp.lt.s32.totalorder %s17_s13, %s17_s13 }
   0xa   :  { %p343_p3 = scmp.ne.s32.totalorder %s17_s13, %s342_s21  ;;  %p348_p5 = scmp.lt.s32.totalorder %s342_s21, %s342_s21 }
   0xc   :  { %p349_p6 = por %p348_p5, %p347_p4 }
   0xe   :  { %p350_p7 = pnand %p349_p6, %p343_p3 }
  0x10   :  { %353 = shalt.err (!%p350_p7)
}
  0x11   :  { %s405_s22 = smov 256   ;;  %s406_s23 = smov 16  }
  0x12   :  { %22 = dma.hbm_to_vmem [thread:$0]  %s510_s0, 2048, %s17_s13, [#allocation3], %s405_s22, %s405_s22, %s406_s23  }
  0x13   :  { %s407_s26 = smov [#allocation5]   ;;  %s354_s30 = scalar_lea.hbm %s511_s1, 3200 }
  0x14   :  { %s28_s27 = sshll.u32 %s407_s26, 4  ;;  %p355_p8 = scmp.ne.s32.totalorder %s511_s1, %s354_s30  ;;  %s29_s27 = int_to_ptr.vmem [resolvable:$true] %s28_s27 }
  0x15   :  { %p358_p9 = scmp.lt.u32.totalorder %s354_s30, %s511_s1 }
  0x17   :  { %p360_p10 = pnand %p358_p9, %p355_p8 }
  0x19   :  { %363 = shalt.err (!%p360_p10)
}
  0x1a   :  { %s364_s8 = scalar_lea.vmem %s29_s27, 3200  ;;  %p369_p12 = scmp.lt.s32.totalorder %s29_s27, %s29_s27 }
  0x1b   :  { %p365_p11 = scmp.ne.s32.totalorder %s29_s27, %s364_s8  ;;  %p370_p13 = scmp.lt.s32.totalorder %s364_s8, %s364_s8 }
  0x1d   :  { %p371_p0 = por %p370_p13, %p369_p12 }
  0x1f   :  { %p372_p1 = pnand %p371_p0, %p365_p11 }
  0x21   :  { %375 = shalt.err (!%p372_p1)
}
  0x22   :  { %s408_s0 = smov 128   ;;  %s409_s9 = smov 8  }
  0x23   :  { %34 = dma.hbm_to_vmem [thread:$0]  %s511_s1, 3200, %s29_s27, [#allocation6], %s408_s0, %s408_s0, %s409_s9  }
  0x24   :  { %398 = dma.done.wait [#allocation3], 2048  }
  0x25   :  { %399 = vsyncadd [#allocation3], 4294965248 }
  0x26   :  { %400 = dma.done.wait [#allocation6], 3200  }
  0x27   :  { %401 = vsyncadd [#allocation6], 4294964096  ;;  %v410_v0 = vmov 0.0|0.0   ;;  %v59_v1 = vld [vmem:[#allocation5] sm:$0xff]  ;;  %v60_v2 = vld [vmem:[#allocation5 + $0x8] sm:$0xff]  ;;  %vm91_vm0 = vcmask 556032  }
  0x28   :  { %261 = vmatprep.subr.bf16.mxu0 %v410_v0  ;;  %297 = vmatprep.subr.bf16.mxu1 %v410_v0  ;;  %v61_v3 = vld [vmem:[#allocation5 + $0x10] sm:$0xff]  ;;  %v262_v4 = vpack.c.bf16 %v60_v2, %v59_v1  ;;  %v62_v5 = vld [vmem:[#allocation5 + $0x18] sm:$0xff]  ;;  %v63_v7 = vld [vmem:[#allocation5 + $0x20] sm:$0xff]  ;;  %v411_v39 = vmov 0.0   ;;  %vm116_vm1 = vcmask 1043456  }
  0x29   :  { %v265_v6 = vpack.c.bf16 %v62_v5, %v61_v3  ;;  %v64_v8 = vld [vmem:[#allocation5 + $0x28] sm:$0xff]  ;;  %v65_v10 = vld [vmem:[#allocation5 + $0x30] sm:$0xff]  ;;  %v66_v11 = vld [vmem:[#allocation5 + $0x38] sm:$0xff] }
  0x2a   :  { %263 = vmatpush1.bf16.msra.mxu0 %v262_v4  ;;  %310 = vmatpush1.bf16.msra.mxu1 %v262_v4  ;;  %v268_v9 = vpack.c.bf16 %v64_v8, %v63_v7  ;;  %v44_v12 = vld [vmem:[#allocation2 + $0x8] sm:$0xff]  ;;  %v271_v14 = vpack.c.bf16 %v66_v11, %v65_v10  ;;  %v67_v15 = vld [vmem:[#allocation5 + $0x40] sm:$0xff]  ;;  %v69_v18 = vld [vmem:[#allocation5 + $0x50] sm:$0xff] }
  0x2b   :  { %264 = vmatprep.subr.bf16.mxu0 %v410_v0  ;;  %298 = vmatprep.subr.bf16.mxu1 %v410_v0  ;;  %v52_v13 = vld [vmem:[#allocation2 + $0x48] sm:$0xff]  ;;  %v70_v19 = vld [vmem:[#allocation5 + $0x58] sm:$0xff]  ;;  %v71_v21 = vld [vmem:[#allocation5 + $0x60] sm:$0xff] }
  0x2c   :  { %253 = vmatprep.mubr.msk.f32.mxu0 %vm91_vm0, %v44_v12  ;;  %257 = vmatprep.mubr.msk.f32.mxu1 %vm91_vm0, %v52_v13  ;;  %v68_v16 = vld [vmem:[#allocation5 + $0x48] sm:$0xff]  ;;  %v277_v20 = vpack.c.bf16 %v70_v19, %v69_v18  ;;  %v73_v24 = vld [vmem:[#allocation5 + $0x70] sm:$0xff]  ;;  %v74_v25 = vld [vmem:[#allocation5 + $0x78] sm:$0xff] }
  0x2d   :  { %v274_v17 = vpack.c.bf16 %v68_v16, %v67_v15  ;;  %v72_v22 = vld [vmem:[#allocation5 + $0x68] sm:$0xff]  ;;  %v283_v26 = vpack.c.bf16 %v74_v25, %v73_v24  ;;  %v75_v27 = vld [vmem:[#allocation5 + $0x80] sm:$0xff]  ;;  %v77_v30 = vld [vmem:[#allocation5 + $0x90] sm:$0xff] }
  0x2e   :  { %266 = vmatpush1.bf16.msra.mxu0 %v265_v6  ;;  %311 = vmatpush1.bf16.msra.mxu1 %v265_v6  ;;  %v280_v23 = vpack.c.bf16 %v72_v22, %v71_v21  ;;  %v76_v28 = vld [vmem:[#allocation5 + $0x88] sm:$0xff]  ;;  %v78_v31 = vld [vmem:[#allocation5 + $0x98] sm:$0xff]  ;;  %v79_v33 = vld [vmem:[#allocation5 + $0xa0] sm:$0xff] }
  0x2f   :  { %267 = vmatprep.subr.bf16.mxu0 %v410_v0  ;;  %299 = vmatprep.subr.bf16.mxu1 %v410_v0  ;;  %v286_v29 = vpack.c.bf16 %v76_v28, %v75_v27  ;;  %v289_v32 = vpack.c.bf16 %v78_v31, %v77_v30  ;;  %v80_v34 = vld [vmem:[#allocation5 + $0xa8] sm:$0xff]  ;;  %v81_v36 = vld [vmem:[#allocation5 + $0xb0] sm:$0xff]  ;;  %v82_v37 = vld [vmem:[#allocation5 + $0xb8] sm:$0xff] }
  0x30   :  { %v292_v35 = vpack.c.bf16 %v80_v34, %v79_v33  ;;  %v295_v38 = vpack.c.bf16 %v82_v37, %v81_v36  ;;  %v83_v40 = vld [vmem:[#allocation5 + $0xc0] sm:$0xf]  ;;  %v46_v43 = vld [vmem:[#allocation2 + $0x18] sm:$0xff]  ;;  %v45_v45 = vld [vmem:[#allocation2 + $0x10] sm:$0xff] }
  0x31   :  { %v43_v41 = vld [vmem:[#allocation2] sm:$0xff]  ;;  %v54_v44 = vld [vmem:[#allocation2 + $0x58] sm:$0xff]  ;;  %v53_v46 = vld [vmem:[#allocation2 + $0x50] sm:$0xff] }
  0x32   :  { %269 = vmatpush1.bf16.msra.mxu0 %v268_v9  ;;  %312 = vmatpush1.bf16.msra.mxu1 %v268_v9  ;;  %v51_v42 = vld [vmem:[#allocation2 + $0x40] sm:$0xff]  ;;  %v48_v47 = vld [vmem:[#allocation2 + $0x28] sm:$0xff]  ;;  %v50_v51 = vld [vmem:[#allocation2 + $0x38] sm:$0xff] }
  0x33   :  { %270 = vmatprep.subr.bf16.mxu0 %v410_v0  ;;  %300 = vmatprep.subr.bf16.mxu1 %v410_v0  ;;  %v56_v48 = vld [vmem:[#allocation2 + $0x68] sm:$0xff]  ;;  %v47_v49 = vld [vmem:[#allocation2 + $0x20] sm:$0xff]  ;;  %v58_v52 = vld [vmem:[#allocation2 + $0x78] sm:$0xff] }
  0x34   :  { %v55_v50 = vld [vmem:[#allocation2 + $0x60] sm:$0xff]  ;;  %v49_v53 = vld [vmem:[#allocation2 + $0x30] sm:$0xff] }
  0x35   :  { %v57_v54 = vld [vmem:[#allocation2 + $0x70] sm:$0xff]  ;;  %v251_v55 = vld [vmem:[%s512_s2] ss:$0 sm:$0xff]  ;;  %s412_s2 = smov [#allocation7]  }
  0x36   :  { %272 = vmatpush1.bf16.msra.mxu0 %v271_v14  ;;  %313 = vmatpush1.bf16.msra.mxu1 %v271_v14  ;;  %s238_s13 = sshll.u32 %s412_s2, 4  ;;  %s239_s13 = int_to_ptr.vmem [resolvable:$true] %s238_s13 }
  0x37   :  { %273 = vmatprep.subr.bf16.mxu0 %v410_v0  ;;  %301 = vmatprep.subr.bf16.mxu1 %v410_v0  ;;  %s376_s14 = scalar_lea.vmem %s239_s13, 1024  ;;  %p381_p3 = scmp.lt.s32.totalorder %s239_s13, %s239_s13 }
  0x38   :  { %p377_p2 = scmp.ne.s32.totalorder %s239_s13, %s376_s14  ;;  %p382_p4 = scmp.lt.s32.totalorder %s376_s14, %s376_s14 }
  0x3a   :  { %275 = vmatpush1.bf16.msra.mxu0 %v274_v17  ;;  %314 = vmatpush1.bf16.msra.mxu1 %v274_v17  ;;  %p383_p5 = por %p382_p4, %p381_p3 }
  0x3b   :  { %276 = vmatprep.subr.bf16.mxu0 %v410_v0  ;;  %302 = vmatprep.subr.bf16.mxu1 %v410_v0 }
  0x3c   :  { %p384_p6 = pnand %p383_p5, %p377_p2 }
  0x3e   :  { %278 = vmatpush1.bf16.msra.mxu0 %v277_v20  ;;  %315 = vmatpush1.bf16.msra.mxu1 %v277_v20 }
  0x3f   :  { %279 = vmatprep.subr.bf16.mxu0 %v410_v0  ;;  %303 = vmatprep.subr.bf16.mxu1 %v410_v0 }
  0x42   :  { %281 = vmatpush1.bf16.msra.mxu0 %v280_v23  ;;  %316 = vmatpush1.bf16.msra.mxu1 %v280_v23 }
  0x43   :  { %282 = vmatprep.subr.bf16.mxu0 %v410_v0  ;;  %304 = vmatprep.subr.bf16.mxu1 %v410_v0 }
  0x46   :  { %284 = vmatpush1.bf16.msra.mxu0 %v283_v26  ;;  %317 = vmatpush1.bf16.msra.mxu1 %v283_v26 }
  0x47   :  { %285 = vmatprep.subr.bf16.mxu0 %v410_v0  ;;  %305 = vmatprep.subr.bf16.mxu1 %v410_v0 }
  0x4a   :  { %287 = vmatpush1.bf16.msra.mxu0 %v286_v29  ;;  %318 = vmatpush1.bf16.msra.mxu1 %v286_v29 }
  0x4b   :  { %288 = vmatprep.subr.bf16.mxu0 %v410_v0  ;;  %306 = vmatprep.subr.bf16.mxu1 %v410_v0 }
  0x4e   :  { %290 = vmatpush1.bf16.msra.mxu0 %v289_v32  ;;  %319 = vmatpush1.bf16.msra.mxu1 %v289_v32 }
  0x4f   :  { %291 = vmatprep.subr.bf16.mxu0 %v410_v0  ;;  %307 = vmatprep.subr.bf16.mxu1 %v410_v0 }
  0x52   :  { %293 = vmatpush1.bf16.msra.mxu0 %v292_v35  ;;  %320 = vmatpush1.bf16.msra.mxu1 %v292_v35 }
  0x53   :  { %294 = vmatprep.subr.bf16.mxu0 %v410_v0  ;;  %308 = vmatprep.subr.bf16.mxu1 %v410_v0 }
  0x56   :  { %296 = vmatpush1.bf16.msra.mxu0 %v295_v38  ;;  %321 = vmatpush1.bf16.msra.mxu1 %v295_v38 }
  0x57   :  { %168 = vmatprep.subr.mxu0 %v411_v39  ;;  %309 = vmatprep.subr.mxu1 %v411_v39 }
  0x5a   :  { %252 = vmatpush1.msk.msra.mxu0 %vm116_vm1, %v83_v40  ;;  %322 = vmatpush1.msk.msra.mxu1 %vm116_vm1, %v83_v40 }
  0x5b   :  { %185 = vmatmul.mubr.f32.vlgmr.msra.gmra.mrb[0].mxu0 %v43_v41  ;;  %205 = vmatmul.mubr.f32.vlgmr.msra.gmra.mrb[0].mxu1 %v51_v42 }
  0x5c   :  { %254 = vmatprep.mubr.msk.f32.mxu0 %vm91_vm0, %v46_v43  ;;  %258 = vmatprep.mubr.msk.f32.mxu1 %vm91_vm0, %v54_v44 }
  0x5f   :  { %190 = vmatmul.mubr.f32.gmra.mrb[2].mxu0 %v45_v45  ;;  %210 = vmatmul.mubr.f32.gmra.mrb[2].mxu1 %v53_v46 }
  0x60   :  { %255 = vmatprep.mubr.msk.f32.mxu0 %vm91_vm0, %v48_v47  ;;  %259 = vmatprep.mubr.msk.f32.mxu1 %vm91_vm0, %v56_v48 }
  0x63   :  { %195 = vmatmul.mubr.f32.gmra.mrb[4].mxu0 %v47_v49  ;;  %215 = vmatmul.mubr.f32.gmra.mrb[4].mxu1 %v55_v50 }
  0x64   :  { %256 = vmatprep.mubr.msk.f32.mxu0 %vm91_vm0, %v50_v51  ;;  %260 = vmatprep.mubr.msk.f32.mxu1 %vm91_vm0, %v58_v52 }
  0x67   :  { %200 = vmatmul.mubr.f32.gmra.mrb[6].mxu0 %v49_v53  ;;  %220 = vmatmul.mubr.f32.gmra.mrb[6].mxu1 %v57_v54 }
 0x12e   :  { %v186_v56 = vpop.f32.mrb[0].mxu0  ;;  %v206_v57 = vpop.f32.mrb[0].mxu1 }
 0x12f   :  { %v187_v58 = vadd.f32 %v251_v55, %v186_v56  ;;  %v207_v59 = vadd.f32 %v251_v55, %v206_v57  ;;  %v188_v60 = vpop.f32.mrb[1].mxu0  ;;  %v208_v61 = vpop.f32.mrb[1].mxu1 }
 0x131   :  { %225 = vst [vmem:[#allocation7] sm:$0xff] %v187_v58  ;;  %229 = vst [vmem:[#allocation7 + $0x20] sm:$0xff] %v207_v59 }
 0x132   :  { %v191_v62 = vpop.f32.mrb[2].mxu0  ;;  %v211_v63 = vpop.f32.mrb[2].mxu1 }
 0x133   :  { %v192_v0 = vadd.f32 %v251_v55, %v191_v62  ;;  %v212_v1 = vadd.f32 %v251_v55, %v211_v63  ;;  %v193_v2 = vpop.f32.mrb[3].mxu0  ;;  %v213_v3 = vpop.f32.mrb[3].mxu1 }
 0x135   :  { %226 = vst [vmem:[#allocation7 + $0x8] sm:$0xff] %v192_v0  ;;  %230 = vst [vmem:[#allocation7 + $0x28] sm:$0xff] %v212_v1 }
 0x136   :  { %v196_v4 = vpop.f32.mrb[4].mxu0  ;;  %v216_v5 = vpop.f32.mrb[4].mxu1 }
 0x137   :  { %v197_v6 = vadd.f32 %v251_v55, %v196_v4  ;;  %v217_v7 = vadd.f32 %v251_v55, %v216_v5  ;;  %v198_v8 = vpop.f32.mrb[5].mxu0  ;;  %v218_v9 = vpop.f32.mrb[5].mxu1 }
 0x139   :  { %227 = vst [vmem:[#allocation7 + $0x10] sm:$0xff] %v197_v6  ;;  %231 = vst [vmem:[#allocation7 + $0x30] sm:$0xff] %v217_v7 }
 0x13a   :  { %v201_v10 = vpop.f32.mrb[6].mxu0  ;;  %v221_v11 = vpop.f32.mrb[6].mxu1 }
 0x13b   :  { %v202_v12 = vadd.f32 %v251_v55, %v201_v10  ;;  %v222_v13 = vadd.f32 %v251_v55, %v221_v11  ;;  %v203_v14 = vpop.f32.mrb[7].mxu0  ;;  %v223_v15 = vpop.f32.mrb[7].mxu1 }
 0x13d   :  { %228 = vst [vmem:[#allocation7 + $0x18] sm:$0xff] %v202_v12  ;;  %232 = vst [vmem:[#allocation7 + $0x38] sm:$0xff] %v222_v13 }
 0x13e   :  { %387 = shalt.err (!%p384_p6)
}
 0x13f   :  { %s388_s17 = scalar_lea.hbm %s513_s3, 1024 }
 0x140   :  { %p389_p7 = scmp.ne.s32.totalorder %s513_s3, %s388_s17  ;;  %p392_p8 = scmp.lt.u32.totalorder %s388_s17, %s513_s3 }
 0x142   :  { %p394_p9 = pnand %p392_p8, %p389_p7 }
 0x144   :  { %397 = shalt.err (!%p394_p9)
}
 0x145   :  { %244 = dma.vmem_to_hbm [thread:$0]  %s239_s13, 1024, %s513_s3, [#allocation4], %s408_s0, %s408_s0, %s409_s9  }
 0x146   :  { %402 = dma.done.wait [#allocation4], 1024  }
 0x147   :  { %403 = vsyncadd [#allocation4], 4294966272 }
 0x148   :  { %248 = vsyncpa [#allocation3], 1 }
 0x149   :  { %249 = vsyncpa [#allocation6], 1 }
 0x14a   :  { %250 = vsyncpa [#allocation4], 1 }

</bundles_post_ra>
